<compile_context>
chip_gen: v5e
topology: v5e:2x2
jax: 0.10.0
libtpu: 0.0.40
codegen_flags: <defaults>
</compile_context>

<pallas_src>
import math
from functools import partial

import jax
import jax.numpy as jnp
from jax import lax
from jax.experimental import pallas as pl
from jax.experimental.pallas import tpu as pltpu


# --------------------------------------------------------------------------- #
# Kernel
# --------------------------------------------------------------------------- #
def _mlp2_kernel(x_ref, w0_ref, b0_ref, w1_ref, b1_ref, o_ref, *, approx_gelu):
    # x_ref : (bn, in_dim)   bf16
    # w0_ref: (in_dim, th)   bf16  (fc0 weight^T, hidden tile)
    # b0_ref: (1, th)        f32
    # w1_ref: (th, out_dim)  bf16  (fc1 weight^T, hidden tile)
    # b1_ref: (1, out_dim)   f32
    # o_ref : (bn, out_dim)  f32   (revisited across the hidden axis -> acts
    #                               as the fc1 accumulator, no scratch needed)
    k = pl.program_id(1)

    # ---- fc0 partial: (bn, in_dim) @ (in_dim, th) on the MXU in bf16 ----
    h = jnp.dot(x_ref[...], w0_ref[...], preferred_element_type=jnp.float32)
    h = h + b0_ref[...]                                   # f32 bias add (VPU)

    # ---- GELU in f32 ----
    if approx_gelu:
        # tanh approximation: transcendental rides the EUP slot (v5e-friendly)
        c = math.sqrt(2.0 / math.pi)
        h = 0.5 * h * (1.0 + jnp.tanh(c * (h + 0.044715 * h * h * h)))
    else:
        # exact erf GELU, matching torch.nn.GELU()
        h = 0.5 * h * (1.0 + lax.erf(h * (1.0 / math.sqrt(2.0))))

    # ---- fc1 partial: (bn, th) @ (th, out_dim), accumulate into o_ref ----
    y_part = jnp.dot(h.astype(jnp.bfloat16), w1_ref[...],
                     preferred_element_type=jnp.float32)

    @pl.when(k == 0)
    def _first():
        o_ref[...] = y_part + b1_ref[...]    # fold b1 in; no separate finalize

    @pl.when(k != 0)
    def _accum():
        o_ref[...] += y_part


# --------------------------------------------------------------------------- #
# Tiling / VMEM budgeting helpers
# --------------------------------------------------------------------------- #
def _round_up(x, m):
    return ((x + m - 1) // m) * m


def _vmem_bytes(bn, in_dim, th, out_dim):
    """Estimated VMEM footprint for one pipelined step (double-buffered inputs
    and output, plus the fc0/GELU intermediate the compiler materializes)."""
    x_b = bn * in_dim * 2 * 2                       # bf16 x, 2 buffers
    w0_b = in_dim * th * 2 * 2                      # bf16 W0^T tile, 2 buffers
    b0_b = 8 * _round_up(th, 128) * 4 * 2           # (1,th) padded to (8,·)
    w1_b = th * out_dim * 2 * 2                     # bf16 W1^T tile, 2 buffers
    b1_b = 8 * _round_up(out_dim, 128) * 4 * 2
    o_b = bn * out_dim * 4 * 2                      # f32 out tile, 2 buffers
    h_b = bn * th * (4 + 2)                         # f32 GELU interm + bf16 copy
    total = x_b + w0_b + b0_b + w1_b + b1_b + o_b + h_b
    return int(total * 1.15) + (2 << 20)            # Mosaic scratch headroom


def _vmem_cap_bytes():
    """~85% of physical VMEM (v7x-safe: never over-request past 64 MiB/TC)."""
    cap = 64 << 20
    try:
        info = pltpu.get_tpu_info()
        cap = int(getattr(info, "vmem_capacity_bytes", cap))
    except Exception:
        pass
    return int(cap * 0.85)


def _hidden_tile_candidates(hidden):
    """hidden first (weight-resident), then halvings that stay /128 divisors."""
    cands = [hidden]
    t = hidden
    while t % 2 == 0:
        t //= 2
        if t % 128 == 0 and hidden % t == 0:
            cands.append(t)
        else:
            break
    return cands


def _select_tiles(n, in_dim, hidden, out_dim, block_n, block_h, cap):
    # Row tile: multiple of 16 (bf16 sublane packing), no larger than needed.
    bn = min(block_n, _round_up(n, 16))
    bn = max(16, (bn // 16) * 16)

    if block_h is not None:
        th = min(block_h, hidden)
        if hidden % th != 0 or th % 128 != 0:
            th = hidden                              # fall back: full hidden
        return bn, th

    # Auto: prefer weight-resident (th == hidden) so W0/W1 are fetched once,
    # otherwise largest dividing hidden tile that fits the VMEM budget.
    cands = _hidden_tile_candidates(hidden)
    for th in cands:
        if _vmem_bytes(bn, in_dim, th, out_dim) <= cap:
            return bn, th
    th = cands[-1]
    while bn > 16 and _vmem_bytes(bn, in_dim, th, out_dim) > cap:
        bn = max(16, bn // 2)
    return bn, th


# --------------------------------------------------------------------------- #
# Public API
# --------------------------------------------------------------------------- #
def prepare_mlp2_params(w0, b0, w1, b1):
    """One-time weight prep (transpose + bf16 cast). Call at model load, NOT
    per forward, so XLA does not re-emit an HBM transpose/convert each call.

    PyTorch conventions: w0 (hidden, in_dim), b0 (hidden,),
                         w1 (out_dim, hidden), b1 (out_dim,).
    """
    hidden, in_dim = w0.shape
    out_dim = w1.shape[0]
    assert w1.shape == (out_dim, hidden)
    return {
        "w0_t": jnp.asarray(w0).T.astype(jnp.bfloat16),          # (in_dim, hidden)
        "b0": jnp.asarray(b0).reshape(1, hidden).astype(jnp.float32),
        "w1_t": jnp.asarray(w1).T.astype(jnp.bfloat16),          # (hidden, out_dim)
        "b1": jnp.asarray(b1).reshape(1, out_dim).astype(jnp.float32),
    }


def mlp2_forward(x, prepared, *, block_n=512, block_h=None, approx_gelu=False):
    """MLP2 forward: fc1(gelu(fc0(x))).

    x: (N, in_dim) float (any float dtype; cast to bf16 for the MXU).
    prepared: output of prepare_mlp2_params.
    Returns (N, out_dim) float32.
    """
    n, in_dim = x.shape
    w0_t, b0 = prepared["w0_t"], prepared["b0"]
    w1_t, b1 = prepared["w1_t"], prepared["b1"]
    hidden = w0_t.shape[1]
    out_dim = w1_t.shape[1]
    assert w0_t.shape == (in_dim, hidden)
    assert w1_t.shape == (hidden, out_dim)

    cap = _vmem_cap_bytes()
    bn, th = _select_tiles(n, in_dim, hidden, out_dim, block_n, block_h, cap)

    x_bf16 = x.astype(jnp.bfloat16)                  # half the x DMA / VMEM

    grid = (pl.cdiv(n, bn), hidden // th)            # partial last row block OK
    vmem_limit = min(max(_vmem_bytes(bn, in_dim, th, out_dim), 32 << 20), cap)

    out = pl.pallas_call(
        partial(_mlp2_kernel, approx_gelu=approx_gelu),
        out_shape=jax.ShapeDtypeStruct((n, out_dim), jnp.float32),
        grid_spec=pltpu.PrefetchScalarGridSpec(
            num_scalar_prefetch=0,
            grid=grid,
            in_specs=[
                pl.BlockSpec((bn, in_dim), lambda i, k: (i, 0)),      # x (bf16)
                pl.BlockSpec((in_dim, th), lambda i, k: (0, k)),      # W0^T tile
                pl.BlockSpec((1, th), lambda i, k: (0, k)),           # b0 tile
                pl.BlockSpec((th, out_dim), lambda i, k: (k, 0)),     # W1^T tile
                pl.BlockSpec((1, out_dim), lambda i, k: (0, 0)),      # b1
            ],
            out_specs=pl.BlockSpec((bn, out_dim), lambda i, k: (i, 0)),
        ),
        compiler_params=pltpu.CompilerParams(
            dimension_semantics=("parallel", "arbitrary"),
            vmem_limit_bytes=int(vmem_limit),
        ),
    )(x_bf16, w0_t, b0, w1_t, b1)

    return out


# --------------------------------------------------------------------------- #
# Reference + demo
# --------------------------------------------------------------------------- #
def _reference(x, w0, b0, w1, b1):
    """Pure-JAX reference with the same bf16-at-MXU numerics as the kernel."""
    h = jnp.dot(x.astype(jnp.bfloat16), w0.T.astype(jnp.bfloat16),
                preferred_element_type=jnp.float32) + b0
    h = 0.5 * h * (1.0 + lax.erf(h * (1.0 / math.sqrt(2.0))))
    return jnp.dot(h.astype(jnp.bfloat16), w1.T.astype(jnp.bfloat16),
                   preferred_element_type=jnp.float32) + b1


if __name__ == "__main__":
    # Small config consistent with MLP2(dims=[in, hidden, out], activation=GELU):
    # in_dim=128, hidden=512, out_dim=256, N=20 tokens (ragged vs the row tile).
    in_dim, hidden, out_dim = 128, 512, 256
    n_tokens = 20

    key = jax.random.PRNGKey(0)
    k_x, k_w0, k_b0, k_w1, k_b1 = jax.random.split(key, 5)

    x = jax.random.normal(k_x, (n_tokens, in_dim), jnp.float32)
    w0 = jax.random.normal(k_w0, (hidden, in_dim), jnp.float32) * math.sqrt(2.0 / in_dim)
    b0 = 0.1 * jax.random.normal(k_b0, (hidden,), jnp.float32)
    w1 = jax.random.normal(k_w1, (out_dim, hidden), jnp.float32) * math.sqrt(2.0 / hidden)
    b1 = 0.1 * jax.random.normal(k_b1, (out_dim,), jnp.float32)

    prepared = prepare_mlp2_params(w0, b0, w1, b1)   # one-time weight prep

    # 1) Hidden-tiled path: small tiles so both grid axes (rows + hidden
    #    accumulation) and the ragged last row block are exercised.
    out_tiled = jax.block_until_ready(
        mlp2_forward(x, prepared, block_n=16, block_h=128))

    # 2) Auto path: weight-resident (th == hidden, weights fetched once).
    out_resident = jax.block_until_ready(mlp2_forward(x, prepared))

    ref = _reference(x, w0, b0, w1, b1)
    assert out_tiled.shape == (n_tokens, out_dim)
    assert out_resident.shape == (n_tokens, out_dim)
    assert jnp.allclose(out_tiled, ref, atol=2e-3, rtol=2e-3), "tiled mismatch"
    assert jnp.allclose(out_resident, ref, atol=2e-3, rtol=2e-3), "resident mismatch"
    assert jnp.allclose(out_tiled, out_resident, atol=2e-3, rtol=2e-3), "path mismatch"

    print("KERNEL_OK")
</pallas_src>

<mosaic_0001>
module attributes {stable_mosaic.version = 11 : i64} {
  func.func @_mlp2_kernel(%arg0: i32, %arg1: i32, %arg2: memref<16x128xbf16, #tpu.memory_space<vmem>>, %arg3: memref<128x128xbf16, #tpu.memory_space<vmem>>, %arg4: memref<1x128xf32, #tpu.memory_space<vmem>>, %arg5: memref<128x256xbf16, #tpu.memory_space<vmem>>, %arg6: memref<1x256xf32, #tpu.memory_space<vmem>>, %arg7: memref<16x256xf32, #tpu.memory_space<vmem>>) attributes {dimension_semantics = [#tpu.dimension_semantics<parallel>, #tpu.dimension_semantics<arbitrary>], iteration_bounds = array<i64: 2, 4>, scalar_prefetch = 0 : i64, scratch_operands = 0 : i64, tpu.core_type = #tpu.core_type<tc>, window_params = [{transform_indices = @transform_0, window_bounds = array<i64: 16, 128>}, {transform_indices = @transform_1, window_bounds = array<i64: 128, 128>}, {transform_indices = @transform_2, window_bounds = array<i64: 1, 128>}, {transform_indices = @transform_3, window_bounds = array<i64: 128, 256>}, {pipeline_mode = #tpu.pipeline_mode<synchronous>, transform_indices = @transform_4, window_bounds = array<i64: 1, 256>}, {transform_indices = @transform_5, window_bounds = array<i64: 16, 256>}]} {
    %c0 = arith.constant 0 : index
    %c0_0 = arith.constant 0 : index
    %0 = vector.load %arg2[%c0, %c0_0] : memref<16x128xbf16, #tpu.memory_space<vmem>>, vector<16x128xbf16>
    %c0_1 = arith.constant 0 : index
    %c0_2 = arith.constant 0 : index
    %1 = vector.load %arg3[%c0_1, %c0_2] : memref<128x128xbf16, #tpu.memory_space<vmem>>, vector<128x128xbf16>
    %cst = arith.constant dense<0.000000e+00> : vector<16x128xf32>
    %2 = tpu.matmul %0, %1, %cst {dimension_numbers = #tpu.dot_dimension_numbers<[1], [0], [0], [1], [0, 0, 1, 1], [], []>} : vector<16x128xbf16>, vector<128x128xbf16>, vector<16x128xf32> -> vector<16x128xf32>
    %c0_3 = arith.constant 0 : index
    %c0_4 = arith.constant 0 : index
    %3 = vector.load %arg4[%c0_3, %c0_4] : memref<1x128xf32, #tpu.memory_space<vmem>>, vector<1x128xf32>
    %4 = vector.broadcast %3 : vector<1x128xf32> to vector<16x128xf32>
    %5 = arith.addf %2, %4 : vector<16x128xf32>
    %cst_5 = arith.constant 5.000000e-01 : f32
    %6 = vector.broadcast %cst_5 : f32 to vector<16x128xf32>
    %7 = arith.mulf %6, %5 : vector<16x128xf32>
    %cst_6 = arith.constant 0.707106769 : f32
    %8 = vector.broadcast %cst_6 : f32 to vector<16x128xf32>
    %9 = arith.mulf %5, %8 : vector<16x128xf32>
    %10 = math.erf %9 : vector<16x128xf32>
    %cst_7 = arith.constant 1.000000e+00 : f32
    %11 = vector.broadcast %cst_7 : f32 to vector<16x128xf32>
    %12 = arith.addf %11, %10 : vector<16x128xf32>
    %13 = arith.mulf %7, %12 : vector<16x128xf32>
    %14 = arith.truncf %13 : vector<16x128xf32> to vector<16x128xbf16>
    %c0_8 = arith.constant 0 : index
    %c0_9 = arith.constant 0 : index
    %15 = vector.load %arg5[%c0_8, %c0_9] : memref<128x256xbf16, #tpu.memory_space<vmem>>, vector<128x256xbf16>
    %cst_10 = arith.constant dense<0.000000e+00> : vector<16x256xf32>
    %16 = tpu.matmul %14, %15, %cst_10 {dimension_numbers = #tpu.dot_dimension_numbers<[1], [0], [0], [1], [0, 0, 1, 1], [], []>} : vector<16x128xbf16>, vector<128x256xbf16>, vector<16x256xf32> -> vector<16x256xf32>
    %c0_i32 = arith.constant 0 : i32
    %17 = arith.cmpi eq, %arg1, %c0_i32 : i32
    %18 = arith.extui %17 : i1 to i32
    %c0_i32_11 = arith.constant 0 : i32
    %19 = arith.cmpi ne, %18, %c0_i32_11 : i32
    scf.if %19 {
      %c0_14 = arith.constant 0 : index
      %c0_15 = arith.constant 0 : index
      %23 = vector.load %arg6[%c0_14, %c0_15] : memref<1x256xf32, #tpu.memory_space<vmem>>, vector<1x256xf32>
      %24 = vector.broadcast %23 : vector<1x256xf32> to vector<16x256xf32>
      %25 = arith.addf %16, %24 : vector<16x256xf32>
      %c0_16 = arith.constant 0 : index
      %c0_17 = arith.constant 0 : index
      %26 = vector.load %arg7[%c0_16, %c0_17] : memref<16x256xf32, #tpu.memory_space<vmem>>, vector<16x256xf32>
      tpu.vector_store %arg7[%c0_16, %c0_17], %25 {strides = array<i32>} : memref<16x256xf32, #tpu.memory_space<vmem>>, vector<16x256xf32>,
    } else {
    }
    %c0_i32_12 = arith.constant 0 : i32
    %20 = arith.cmpi ne, %arg1, %c0_i32_12 : i32
    %21 = arith.extui %20 : i1 to i32
    %c0_i32_13 = arith.constant 0 : i32
    %22 = arith.cmpi ne, %21, %c0_i32_13 : i32
    scf.if %22 {
      %c0_14 = arith.constant 0 : index
      %c0_15 = arith.constant 0 : index
      %23 = vector.load %arg7[%c0_14, %c0_15] : memref<16x256xf32, #tpu.memory_space<vmem>>, vector<16x256xf32>
      %24 = arith.addf %23, %16 : vector<16x256xf32>
      %c0_16 = arith.constant 0 : index
      %c0_17 = arith.constant 0 : index
      %25 = vector.load %arg7[%c0_16, %c0_17] : memref<16x256xf32, #tpu.memory_space<vmem>>, vector<16x256xf32>
      tpu.vector_store %arg7[%c0_16, %c0_17], %24 {strides = array<i32>} : memref<16x256xf32, #tpu.memory_space<vmem>>, vector<16x256xf32>,
    } else {
    }
    return
  }
  func.func @transform_0(%arg0: i32, %arg1: i32) -> (i32, i32) {
    %c0_i32 = arith.constant 0 : i32
    %c0_i32_0 = arith.constant 0 : i32
    return %arg0, %c0_i32 : i32, i32
  }
  func.func @transform_1(%arg0: i32, %arg1: i32) -> (i32, i32) {
    %c0_i32 = arith.constant 0 : i32
    %c0_i32_0 = arith.constant 0 : i32
    return %c0_i32, %arg1 : i32, i32
  }
  func.func @transform_2(%arg0: i32, %arg1: i32) -> (i32, i32) {
    %c0_i32 = arith.constant 0 : i32
    %c0_i32_0 = arith.constant 0 : i32
    return %c0_i32, %arg1 : i32, i32
  }
  func.func @transform_3(%arg0: i32, %arg1: i32) -> (i32, i32) {
    %c0_i32 = arith.constant 0 : i32
    %c0_i32_0 = arith.constant 0 : i32
    return %arg1, %c0_i32 : i32, i32
  }
  func.func @transform_4(%arg0: i32, %arg1: i32) -> (i32, i32) {
    %c0_i32 = arith.constant 0 : i32
    %c0_i32_0 = arith.constant 0 : i32
    %c0_i32_1 = arith.constant 0 : i32
    return %c0_i32, %c0_i32_0 : i32, i32
  }
  func.func @transform_5(%arg0: i32, %arg1: i32) -> (i32, i32) {
    %c0_i32 = arith.constant 0 : i32
    %c0_i32_0 = arith.constant 0 : i32
    return %arg0, %c0_i32 : i32, i32
  }
}

</mosaic_0001>

<bundles_post_ra>
// kernel: tpu_custom_call.1
= control target key start
LH: loop header
LB: loop body
LE: loop exit
PB: predicated region body
PF: predicated region fallthrough
CT: control target
= control target key end

     0   :  { %s1904_s0 = inlined_call_operand.hbm [shape: bf16[20,128], index: 0, kind: input, shape index: {}]   ;;  %s1905_s1 = inlined_call_operand.hbm [shape: bf16[128,512], index: 1, kind: input, shape index: {}]   ;;  %s1906_s2 = inlined_call_operand.hbm [shape: f32[1,512], index: 2, kind: input, shape index: {}]   ;;  %s1907_s3 = inlined_call_operand.hbm [shape: bf16[512,256], index: 3, kind: input, shape index: {}]   ;;  %s1908_s4 = inlined_call_operand.vmem [shape: f32[1,256], index: 4, kind: input, shape index: {}]   ;;  %s1909_s5 = inlined_call_operand.hbm [shape: f32[20,256], index: 5, kind: output, shape index: {}]  }
   0x1   :  { %1921 = sst [smem:[#allocation25_spill]] %s1904_s0 }
   0x2   :  { %1922 = sst [smem:[#allocation26_spill]] %s1905_s1 }
   0x3   :  { %1923 = sst [smem:[#allocation27_spill]] %s1909_s5 }
   0x4   :  { %10 = vsyncpa [#allocation3], 0 }
   0x5   :  { %12 = vsyncpa [#allocation3 + $0x1], 0 }
   0x6   :  { %13 = vsyncpa [#allocation6], 0 }
   0x7   :  { %15 = vsyncpa [#allocation6 + $0x1], 0 }
   0x8   :  { %16 = vsyncpa [#allocation9], 0 }
   0x9   :  { %18 = vsyncpa [#allocation9 + $0x1], 0 }
   0xa   :  { %19 = vsyncpa [#allocation4], 0 }
   0xb   :  { %21 = vsyncpa [#allocation4 + $0x1], 0  ;;  %s1490_s18 = smov 0   ;;  %s1492_s19 = smov 0  }
   0xc   :  { %s1494_s20 = smov 0   ;;  %s1496_s21 = smov 0  }
   0xd   :  { %s1498_s22 = smov 0   ;;  %s1500_s23 = smov 0  }
   0xe   :  { %s1502_s24 = smov 0   ;;  %s1504_s25 = smov 0  }
   0xf   :  { %s1506_s26 = smov 0   ;;  %s1508_s27 = smov 0  }
  0x10   :  { %s1510_s28 = smov 0  }
  0x11 LB: > { %1924 = sst [smem:[#allocation15_spill]] %s1415_s20  ;;  %s1546_s29 = sadd.s32 4294967295, %s1447_s28   ;;  %s1447_s28 = sphi %s1510_s28, %s27_s28   ;;  %s1443_s27 = sphi %s1508_s27, %s1964_s27   ;;  %s1439_s26 = sphi %s1506_s26, %s1963_s26   ;;  %s1435_s25 = sphi %s1504_s25, %s1955_s25   ;;  %s1431_s24 = sphi %s1502_s24, %s1962_s24   ;;  %s1427_s23 = sphi %s1500_s23, %s1954_s23   ;;  %s1423_s22 = sphi %s1498_s22, %s1961_s22   ;;  %s1419_s21 = sphi %s1496_s21, %s1960_s21   ;;  %s1415_s20 = sphi %s1494_s20, %s1952_s20   ;;  %s1411_s19 = sphi %s1492_s19, %s1959_s19   ;;  %s1407_s18 = sphi %s1490_s18, %s1958_s18  }
  0x12   : > { %1925 = sst [smem:[#allocation16_spill]] %s1419_s21  ;;  %s901_s30 = sadd.s32 4294967294, %s1447_s28  }
  0x13   : > { %1926 = sst [smem:[#allocation17_spill]] %s1427_s23  ;;  %s36_s6 = sadd.s32 1, %s1439_s26 }
  0x14   : > { %1927 = sst [smem:[#allocation18_spill]] %s1435_s25  ;;  %s39_s7 = sadd.s32 1, %s1443_s27 }
  0x15   : > { %1928 = sst [smem:[#allocation19_spill]] %s1443_s27  ;;  %p37_p0 = scmp.ge.s32.totalorder %s36_s6, 4 }
  0x16   : > { %s46_s8 = sadd.s32 1, %s1427_s23  ;;  %p53_p1 = scmp.ne.s32.totalorder %s1427_s23, %s1423_s22 }
  0x17   : > { %p54_p2 = scmp.eq.s32.totalorder %s1447_s28, 0  ;;  %s1966_s6 = smov (%p37_p0, %s36_s6), 0 }
  0x18   : > { %1929 = sst [smem:[#allocation20_spill]] %s1966_s6  ;;  %s1968_s7 = smov (!%p37_p0, %s39_s7), %s1443_s27 }
  0x19   : > { %p1563_p3 = por %p54_p2, %p53_p1  ;;  %p1910_p4 = scmp.ne.s32.totalorder %s1423_s22, %s1419_s21 }
  0x1a   : > { %p41_p5 = scmp.ge.s32.totalorder %s1968_s7, 2  ;;  %p60_p6 = scmp.eq.s32.totalorder %s1546_s29, 0 }
  0x1b   : > { %s69_s10 = ssub.s32 %s1439_s26, %s1966_s6  ;;  %s72_s11 = sadd.s32 1, %s1415_s20 }
  0x1c   : > { %s1970_s7 = smov (%p41_p5, %s1968_s7), 0  ;;  %p1580_p7 = por %p60_p6, %p1910_p4 }
  0x1d   : > { %1931 = sst [smem:[#allocation21_spill]] %s1970_s7  ;;  %p70_p8 = scmp.eq.s32.totalorder %s69_s10, 0 }
  0x1e   : > { %s43_s13 = ssub.s32 %s1443_s27, %s1970_s7  ;;  %p79_p9 = scmp.ne.s32.totalorder %s1415_s20, %s1411_s19 }
  0x1f   : > { %p44_p10 = scmp.eq.s32.totalorder %s43_s13, 0  ;;  %p85_p11 = scmp.ne.s32.totalorder %s1411_s19, %s1407_s18 }
  0x20   : > { %s1591_s14 = scalar_select %p70_p8, %s1415_s20, %s72_s11  }
  0x21   : > { %s1594_s15 = scalar_select %p44_p10, %s1427_s23, %s46_s8  }
  0x22   : > { %1933 = sst [smem:[#allocation22_spill]] %s1591_s14  ;;  %p1598_p12 = por %p79_p9, %p54_p2 }
  0x23   : > { %1934 = sst [smem:[#allocation23_spill]] %s1594_s15  ;;  %p1604_p13 = por %p85_p11, %p60_p6 }
  0x24   : > { %p182_p0 = scmp.eq.s32.totalorder %s1546_s29, 7  ;;  %p188_p5 = scmp.eq.s32.totalorder %s901_s30, 7 }
  0x25   : > { %p1938_p8 = scmp.ne.s32.totalorder %s1423_s22, %s1419_s21  ;;  %p903_p2 = scmp.ge.s32.totalorder %s1447_s28, 8 }
  0x26   : > { %p1612_p4 = por %p182_p0, %p53_p1 }
  0x27   : > { %p1619_p10 = por %p188_p5, %p1938_p8  ;;  %207 = sbr.rel (%p903_p2) target bundleno = 103 (0x67), region = 20 }
  0x29   : > { %s1939_s18 = scalar_select %p1619_p10, 1, 0 }
  0x2b   : > { %1940 = sst [smem:[#allocation24_spill]] %s1939_s18 }
  0x2c   : > { %210 = sbr.rel (!%p1563_p3) target bundleno = 87 (0x57), region = 24  ;;  %s211_s8 = sand.u32 (%p1563_p3), 1, %s1427_s23  }
  0x2d   : > { %s905_s30 = sshll.u32 (%p1563_p3), %s1443_s27, 1  ;;  %s904_s11 = sshll.u32 (%p1563_p3), %s211_s8, 3 }
  0x2e   : > { %s217_s13 = ssub.s32 (%p1563_p3), 3, %s905_s30  ;;  %s1631_s14 = scalar_lea.sflag (%p1563_p3), [#allocation3], %s211_s8 }
  0x2f   : > { %p218_p1 = scmp.lt.s32.totalorder (%p1563_p3), %s217_s13, 2  ;;  %s215_s18 = scalar_lea.vmem (%p1563_p3), [#allocation2], %s904_s11 }
  0x31   : > { %s1972_s13 = smov (!%p218_p1, %s217_s13), 2 }
  0x32   : > { %s906_s7 = sshll.u32 %s1972_s13, 2 }
  0x33   : > { %s221_s6 = ssub.s32 8, %s906_s7 }
  0x34   : > { %s222_s15 = sshll.u32 %s221_s6, 4 }
  0x35   : > { %223 = vsyncadd %s1631_s14, %s222_s15  ;;  %p1634_p3 = scmp.ne.s32.totalorder %s906_s7, 0  ;;  %s1037_s30 = sshll.u32 %s1443_s27, 3 }
  0x36   : > { %s1942_s0 = sld [smem:[#allocation25_spill]]  ;;  %s1642_s25 = sshll.u32 %s215_s18, 4  ;;  %s231_s25 = int_to_ptr.vmem [resolvable:$true] %s1642_s25 }
  0x37   : > { %s1918_s15 = sshll.u32 %s1972_s13, 6 }
  0x38   : > { %s1185_s7 = sshrl.u32 %s1918_s15, 4 }
  0x3c   : > { %s226_s5 = scalar_lea.hbm %s1942_s0, %s1037_s30  ;;  %s1194_s18 = scalar_lea.hbm %s1942_s0, 12 }
  0x3d   : > { %s228_s6 = sshll.u32 %s226_s5, 4  ;;  %s1645_s6 = int_to_ptr.hbm [resolvable:$true] %s228_s6 }
  0x3e   : > { %s1183_s8 = sshra.s32 %s1645_s6, 4  ;;  %s1184_s8 = int_to_ptr.hbm [resolvable:$true] %s1183_s8 }
  0x3f   : > { %s1190_s11 = scalar_lea.hbm %s1184_s8, %s1185_s7 }
  0x40   : > { %p1191_p6 = scmp.ne.s32.totalorder %s1184_s8, %s1190_s11  ;;  %p1196_p0 = scmp.lt.s32.totalorder %s1194_s18, %s1190_s11 }
  0x42   : > { %p1192_p9 = pnand %p1191_p6, %p1634_p3 }
  0x44   : > { %p1193_p11 = pneg %p1192_p9 }
  0x46   : > { %p1198_p5 = pnand %p1196_p0, %p1193_p11 }
  0x48   : > { %1201 = shalt.err (!%p1198_p5)
}
  0x49   : > { %s1202_s5 = sshra.s32 %s231_s25, 4  ;;  %s1449_s8 = smov [#allocation2]   ;;  %s1203_s5 = int_to_ptr.vmem [resolvable:$true] %s1202_s5 }
  0x4a   : > { %s1209_s30 = scalar_lea.vmem %s1203_s5, %s1185_s7  ;;  %s1213_s15 = scalar_lea.vmem %s1449_s8, 16 }
  0x4b   : > { %p1210_p8 = scmp.ne.s32.totalorder %s1203_s5, %s1209_s30  ;;  %p1215_p6 = scmp.lt.s32.totalorder %s1213_s15, %s1209_s30 }
  0x4d   : > { %p1211_p2 = pnand %p1210_p8, %p1634_p3 }
  0x4f   : > { %p1212_p1 = pneg %p1211_p2 }
  0x51   : > { %p1217_p9 = pnand %p1215_p6, %p1212_p1 }
  0x53   : > { %1220 = shalt.err (!%p1217_p9)
}
  0x54   : > { %s1450_s21 = smov 64   ;;  %s1451_s11 = smov 4  }
  0x55   : > { %s1943_s23 = sshll.u32 %s1972_s13, 6 }
  0x56   : > { %236 = dma.hbm_to_vmem [thread:$0]  (%p1634_p3), %s1645_s6, %s1943_s23, %s231_s25, %s1631_s14, %s1450_s21, %s1450_s21, %s1451_s11  }
  0x57 PF: > { %s240_s15 = sand.u32 1, %s1447_s28   ;;  %s1670_s7 = sand.u32 1, %s1415_s20  }
  0x58   : > { %s911_s18 = sshll.u32 %s1670_s7, 6  ;;  %s912_s5 = sshll.u32 %s1439_s26, 2 }
  0x59   : > { %s1944_s1 = sld [smem:[#allocation26_spill]]  ;;  %s244_s0 = scalar_lea.vmem [#allocation5], %s911_s18 }
  0x5a   : > { %s251_s25 = sshll.u32 %s244_s0, 4  ;;  %s241_s13 = scalar_lea.sflag [#allocation6], %s240_s15  ;;  %s252_s25 = int_to_ptr.vmem [resolvable:$true] %s251_s25 }
  0x5b   : > { %s1452_s6 = smov 256   ;;  %s1453_s21 = smov 64  }
  0x5c   : > { %s1454_s11 = smov 4   ;;  %s267_s30 = scalar_lea.hbm %s1906_s2, %s1439_s26 }
  0x5d   : > { %s264_s18 = scalar_lea.vmem [#allocation7], %s1670_s7  ;;  %s913_s8 = sshll.u32 %s1670_s7, 7 }
  0x5e   : > { %s271_s0 = sshll.u32 %s264_s18, 4  ;;  %s1039_s15 = sshll.u32 %s1439_s26, 7  ;;  %s272_s0 = int_to_ptr.vmem [resolvable:$true] %s271_s0 }
  0x5f   : > { %s248_s9 = scalar_lea.hbm %s1944_s1, %s912_s5  ;;  %s269_s5 = sshll.u32 %s267_s30, 4  ;;  %s270_s5 = int_to_ptr.hbm [resolvable:$true] %s269_s5 }
  0x60   : > { %s249_s14 = sshll.u32 %s248_s9, 4  ;;  %s288_s20 = scalar_lea.hbm %s1907_s3, %s1039_s15  ;;  %s250_s14 = int_to_ptr.hbm [resolvable:$true] %s249_s14 }
  0x61   : > { %1068 = dma.hbm_to_vmem [thread:$0]  (%p1598_p12), %s250_s14, 1024, %s252_s25, %s241_s13, %s1452_s6, %s1453_s21, %s1454_s11  }
  0x62   : > { %1069 = dma.hbm_to_vmem [thread:$0]  (%p1598_p12), %s270_s5, 16, %s272_s0, %s241_s13  }
  0x63   : > { %s282_s25 = scalar_lea.vmem [#allocation8], %s913_s8  ;;  %s289_s6 = sshll.u32 %s288_s20, 4  ;;  %s290_s6 = int_to_ptr.hbm [resolvable:$true] %s289_s6 }
  0x64   : > { %s291_s14 = sshll.u32 %s282_s25, 4  ;;  %s279_s27 = scalar_lea.sflag [#allocation9], %s1670_s7  ;;  %s292_s14 = int_to_ptr.vmem [resolvable:$true] %s291_s14 }
  0x65   : > { %s1455_s21 = smov 128   ;;  %s1456_s11 = smov 8  }
  0x66   : > { %1070 = dma.hbm_to_vmem [thread:$0]  (%p1598_p12), %s290_s6, 2048, %s292_s14, %s279_s27, %s1455_s21, %s1455_s21, %s1456_s11  }
  0x67 PF: > { %p917_p3 = scmp.ge.s32.totalorder %s1447_s28, 1  ;;  %p299_p11 = scmp.lt.s32.totalorder %s1447_s28, 9 }
  0x69   : > { %p300_p0 = pnand %p917_p3, %p299_p11 }
  0x6a   : > { %s1697_s1 = sand.u32 (!%p300_p0), 1, %s1423_s22  }
  0x6b   : > { %303 = sbr.rel (%p300_p0) target bundleno = 547 (0x223), region = 40  ;;  %s918_s20 = sshll.u32 (!%p300_p0), %s1697_s1, 3 }
  0x6c   : > { %s306_s13 = scalar_lea.sflag (!%p300_p0), [#allocation3], %s1697_s1  ;;  %s1701_s7 = scalar_lea.vmem (!%p300_p0), [#allocation2], %s918_s20 }
  0x70   : > { %1390 = dma.done.wait (%p1580_p7), %s306_s13, 128  }
  0x71   : > { %1392 = vsyncadd (%p1580_p7), %s306_s13, 4294967168  ;;  %s315_s16 = sand.u32 1, %s1546_s29   ;;  %s1709_s23 = sand.u32 1, %s1411_s19  }
  0x72   : > { %s919_s30 = sshll.u32 %s1709_s23, 6  ;;  %s316_s5 = scalar_lea.sflag [#allocation6], %s315_s16 }
  0x73   : > { %s319_s18 = scalar_lea.vmem [#allocation5], %s919_s30 }
  0x74   : > { %1394 = dma.done.wait (%p1604_p13), %s316_s5, 1040  }
  0x75   : > { %1396 = vsyncadd (%p1604_p13), %s316_s5, 4294966256  ;;  %s920_s12 = sshll.u32 %s1709_s23, 7  ;;  %s328_s0 = scalar_lea.vmem [#allocation7], %s1709_s23 }
  0x76   : > { %s335_s8 = scalar_lea.sflag [#allocation9], %s1709_s23  ;;  %s1719_s15 = scalar_lea.vmem [#allocation8], %s920_s12 }
  0x77   : > { %1398 = dma.done.wait (%p1604_p13), %s335_s8, 2048  }
  0x78   : > { %1400 = vsyncadd (%p1604_p13), %s335_s8, 4294965248  ;;  %s921_s29 = sshll.u32 %s1697_s1, 5  ;;  %v1048_v0 = vld [vmem:[%s319_s18 + $0x38] sm:$0xff]  ;;  %v1047_v1 = vld [vmem:[%s319_s18 + $0x30] sm:$0xff]  ;;  %p1024_p7 = scmp.ne.s32.totalorder %s1431_s24, 0 }
  0x79   : > { %468 = vmatpush.bf16.msra.mxu0 %v1048_v0  ;;  %v1046_v2 = vld [vmem:[%s319_s18 + $0x28] sm:$0xff]  ;;  %v1045_v3 = vld [vmem:[%s319_s18 + $0x20] sm:$0xff]  ;;  %v1044_v4 = vld [vmem:[%s319_s18 + $0x18] sm:$0xff]  ;;  %s1803_s17 = scalar_lea.vmem [#allocation10], %s921_s29 }
  0x7a   : > { %v1043_v5 = vld [vmem:[%s319_s18 + $0x10] sm:$0xff]  ;;  %v1042_v6 = vld [vmem:[%s319_s18 + $0x8] sm:$0xff]  ;;  %v1041_v7 = vld [vmem:[%s319_s18] sm:$0xff] }
  0x7b   : > { %v1040_v8 = vld [vmem:[%s1701_s7] sm:$0xff]  ;;  %v1010_v18 = vld [vmem:[%s1719_s15 + $0x60] sm:$0xf]  ;;  %v1062_v19 = vld [vmem:[%s1719_s15 + $0x64] sm:$0xf0] }
  0x7c   : > { %v1178_v9 = vld [vmem:[%s328_s0] ss:$0 sm:$0xff]  ;;  %v1018_v10 = vld [vmem:[%s1719_s15 + $0x70] sm:$0xf]  ;;  %v1064_v11 = vld [vmem:[%s1719_s15 + $0x74] sm:$0xf0]  ;;  %v1011_v22 = vor.u32 %v1062_v19, %v1010_v18 }
  0x7d   : > { %469 = vmatpush.bf16.msra.mxu0 %v1047_v1  ;;  %v1063_v12 = vld [vmem:[%s1719_s15 + $0x74] sm:$0xf]  ;;  %v1019_v13 = vor.u32 %v1064_v11, %v1018_v10  ;;  %v1020_v14 = vld [vmem:[%s1719_s15 + $0x78] sm:$0xf0]  ;;  %v1061_v20 = vld [vmem:[%s1719_s15 + $0x64] sm:$0xf] }
  0x7e   : > { %v1023_v16 = vor.u32 %v1063_v12, %v1020_v14  ;;  %v1012_v23 = vld [vmem:[%s1719_s15 + $0x68] sm:$0xf0]  ;;  %v1002_v26 = vld [vmem:[%s1719_s15 + $0x50] sm:$0xf]  ;;  %v1060_v27 = vld [vmem:[%s1719_s15 + $0x54] sm:$0xf0] }
  0x7f   : > { %667 = vmatpush.bf16.msra.mxu1 %v1019_v13  ;;  %v1015_v24 = vor.u32 %v1061_v20, %v1012_v23  ;;  %v1059_v28 = vld [vmem:[%s1719_s15 + $0x54] sm:$0xf]  ;;  %v1003_v29 = vor.u32 %v1060_v27, %v1002_v26  ;;  %v1004_v30 = vld [vmem:[%s1719_s15 + $0x58] sm:$0xf0]  ;;  %v994_v31 = vld [vmem:[%s1719_s15 + $0x40] sm:$0xf] }
  0x80   : > { %681 = vmatpush.bf16.msra.mxu2 %v1023_v16  ;;  %v1058_v32 = vld [vmem:[%s1719_s15 + $0x44] sm:$0xf0]  ;;  %v1007_v34 = vor.u32 %v1059_v28, %v1004_v30  ;;  %v1057_v35 = vld [vmem:[%s1719_s15 + $0x44] sm:$0xf]  ;;  %v996_v36 = vld [vmem:[%s1719_s15 + $0x48] sm:$0xf0] }
  0x81   : > { %470 = vmatpush.bf16.msra.mxu0 %v1046_v2  ;;  %v995_v40 = vor.u32 %v1058_v32, %v994_v31  ;;  %v999_v41 = vor.u32 %v1057_v35, %v996_v36  ;;  %v986_v42 = vld [vmem:[%s1719_s15 + $0x30] sm:$0xf]  ;;  %v1056_v43 = vld [vmem:[%s1719_s15 + $0x34] sm:$0xf0]  ;;  %v1055_v45 = vld [vmem:[%s1719_s15 + $0x34] sm:$0xf] }
  0x82   : > { %v988_v46 = vld [vmem:[%s1719_s15 + $0x38] sm:$0xf0]  ;;  %v987_v49 = vor.u32 %v1056_v43, %v986_v42  ;;  %v978_v51 = vld [vmem:[%s1719_s15 + $0x20] sm:$0xf]  ;;  %v1054_v52 = vld [vmem:[%s1719_s15 + $0x24] sm:$0xf0] }
  0x83   : > { %668 = vmatpush.bf16.msra.mxu1 %v1011_v22  ;;  %v991_v50 = vor.u32 %v1055_v45, %v988_v46  ;;  %v1053_v55 = vld [vmem:[%s1719_s15 + $0x24] sm:$0xf]  ;;  %v980_v56 = vld [vmem:[%s1719_s15 + $0x28] sm:$0xf0]  ;;  %v979_v60 = vor.u32 %v1054_v52, %v978_v51  ;;  %v970_v63 = vld [vmem:[%s1719_s15 + $0x10] sm:$0xf] }
  0x84   : > { %682 = vmatpush.bf16.msra.mxu2 %v1015_v24  ;;  %v983_v62 = vor.u32 %v1053_v55, %v980_v56  ;;  %v1052_v0 = vld [vmem:[%s1719_s15 + $0x14] sm:$0xf0]  ;;  %v1051_v1 = vld [vmem:[%s1719_s15 + $0x14] sm:$0xf]  ;;  %v962_v12 = vld [vmem:[%s1719_s15] sm:$0xf] }
  0x85   : > { %471 = vmatpush.bf16.msra.mxu0 %v1045_v3  ;;  %v1050_v13 = vld [vmem:[%s1719_s15 + $0x4] sm:$0xf0]  ;;  %v1049_v14 = vld [vmem:[%s1719_s15 + $0x4] sm:$0xf]  ;;  %v964_v18 = vld [vmem:[%s1719_s15 + $0x8] sm:$0xf0] }
  0x86   : > { %v963_v23 = vor.u32 %v1050_v13, %v962_v12 }
  0x87   : > { %669 = vmatpush.bf16.msra.mxu1 %v1003_v29 }
  0x88   : > { %683 = vmatpush.bf16.msra.mxu2 %v1007_v34 }
  0x89   : > { %472 = vmatpush.bf16.msra.mxu0 %v1044_v4  ;;  %v972_v4 = vld [vmem:[%s1719_s15 + $0x18] sm:$0xf0] }
  0x8a   : > { %v975_v11 = vor.u32 %v1051_v1, %v972_v4 }
  0x8b   : > { %670 = vmatpush.bf16.msra.mxu1 %v995_v40 }
  0x8c   : > { %684 = vmatpush.bf16.msra.mxu2 %v999_v41 }
  0x8d   : > { %473 = vmatpush.bf16.msra.mxu0 %v1043_v5 }
  0x8f   : > { %671 = vmatpush.bf16.msra.mxu1 %v987_v49 }
  0x90   : > { %685 = vmatpush.bf16.msra.mxu2 %v991_v50 }
  0x91   : > { %474 = vmatpush.bf16.msra.mxu0 %v1042_v6 }
  0x93   : > { %672 = vmatpush.bf16.msra.mxu1 %v979_v60 }
  0x94   : > { %686 = vmatpush.bf16.msra.mxu2 %v983_v62 }
  0x95   : > { %475 = vmatpush.bf16.msra.mxu0 %v1041_v7 }
  0x98   : > { %476 = vmatmul.bf16.vlgmr.msra.gmra.mxu0 %v1040_v8  ;;  %687 = vmatpush.bf16.msra.mxu2 %v975_v11 }
 0x115   : > { %v477_v15 = vpop.f32.mrf.mxu0 }
 0x116   : > { %v1731_v17 = vadd.f32 %v1178_v9, %v477_v15 }
 0x118   : > { %v1737_v21 = vmul.f32 0.70710677, %v1731_v17 }
 0x11a   : > { %v486_v25 = vmul.f32 %v1737_v21, %v1737_v21 }
 0x11c   : > { %v1748_v33 = vmin.f32 %v486_v25, 16.0  ;;  %v967_v25 = vor.u32 %v1049_v14, %v964_v18 }
 0x11d   : > { %v479_v37 = vpop.f32.mrf.mxu0 }
 0x11e   : > { %v488_v38 = vmul.f32 2.1237322e-06, %v1748_v33  ;;  %v1753_v39 = vadd.f32 %v1178_v9, %v479_v37  ;;  %v499_v53 = vmul.f32 3.8918573e-05, %v1748_v33  ;;  %v971_v9 = vor.u32 %v1052_v0, %v970_v63  ;;  %688 = vmatpush.bf16.msra.mxu2 %v967_v25 }
 0x120   : > { %v1758_v44 = vmul.f32 0.70710677, %v1753_v39  ;;  %v489_v47 = vadd.f32 0.00028619796, %v488_v38  ;;  %v500_v57 = vadd.f32 0.001143296, %v499_v53  ;;  %673 = vmatpush.bf16.msra.mxu1 %v971_v9 }
 0x121   : > { %v483_v11 = vmul.f32 0.5, %v1753_v39 }
 0x122   : > { %v526_v48 = vmul.f32 %v1758_v44, %v1758_v44  ;;  %v490_v58 = vmul.f32 %v489_v47, %v1748_v33  ;;  %v501_v2 = vmul.f32 %v500_v57, %v1748_v33 }
 0x124   : > { %v1767_v54 = vmin.f32 %v526_v48, 16.0  ;;  %v502_v6 = vadd.f32 0.014752088, %v501_v2  ;;  %v491_v7 = vadd.f32 0.0036580483, %v490_v58  ;;  %674 = vmatpush.bf16.msra.mxu1 %v963_v23 }
 0x126   : > { %v528_v59 = vmul.f32 2.1237322e-06, %v1767_v54  ;;  %v539_v61 = vmul.f32 3.8918573e-05, %v1767_v54  ;;  %v503_v15 = vmul.f32 %v502_v6, %v1748_v33  ;;  %v492_v22 = vmul.f32 %v491_v7, %v1748_v33 }
 0x128   : > { %v529_v3 = vadd.f32 0.00028619796, %v528_v59  ;;  %v540_v5 = vadd.f32 0.001143296, %v539_v61  ;;  %v504_v20 = vadd.f32 0.112945676, %v503_v15 }
 0x129   : > { %v493_v30 = vadd.f32 0.05243302, %v492_v22 }
 0x12a   : > { %v530_v8 = vmul.f32 %v529_v3, %v1767_v54  ;;  %v541_v10 = vmul.f32 %v540_v5, %v1767_v54  ;;  %v505_v26 = vmul.f32 %v504_v20, %v1748_v33 }
 0x12b   : > { %v494_v37 = vmul.f32 %v493_v30, %v1748_v33 }
 0x12c   : > { %v531_v16 = vadd.f32 0.0036580483, %v530_v8  ;;  %v542_v19 = vadd.f32 0.014752088, %v541_v10  ;;  %v506_v29 = vadd.f32 0.4994258, %v505_v26 }
 0x12d   : > { %v495_v42 = vadd.f32 0.18741608, %v494_v37 }
 0x12e   : > { %v543_v24 = vmul.f32 %v542_v19, %v1767_v54  ;;  %v532_v27 = vmul.f32 %v531_v16, %v1767_v54  ;;  %v507_v32 = vmul.f32 %v506_v29, %v1748_v33 }
 0x12f   : > { %v496_v46 = vmul.f32 %v495_v42, %v1748_v33 }
 0x130   : > { %v544_v28 = vadd.f32 0.112945676, %v543_v24  ;;  %v533_v34 = vadd.f32 0.05243302, %v532_v27  ;;  %v508_v36 = vadd.f32 1.0, %v507_v32 }
 0x131   : > { %v497_v53 = vadd.f32 1.1283791, %v496_v46 }
 0x132   : > { %v545_v31 = vmul.f32 %v544_v28, %v1767_v54  ;;  %1179 = vrcp.f32 %v508_v36  ;;  %v534_v40 = vmul.f32 %v533_v34, %v1767_v54  ;;  %v520_v51 = vand.u32 2147483648, %v508_v36 }
 0x133   : > { %v518_v56 = vand.u32 2147483647, %v508_v36  ;;  %vm514_vm1 = vweird.f32 %v508_v36  ;;  %v498_v63 = vmul.f32 %v497_v53, %v1737_v21  ;;  %v482_v21 = vmul.f32 0.5, %v1731_v17 }
 0x134   : > { %v546_v35 = vadd.f32 0.4994258, %v545_v31  ;;  %v535_v43 = vadd.f32 0.18741608, %v534_v40  ;;  %v521_v61 = vor.u32 1.1754944e-38, %v520_v51 }
 0x135   : > { %vm519_vm4 = vcmp.eq.f32.partialorder %v518_v56, 8.507059e+37 }
 0x136   : > { %v547_v38 = vmul.f32 %v546_v35, %v1767_v54  ;;  %v536_v49 = vmul.f32 %v535_v43, %v1767_v54 }
 0x138   : > { %v548_v41 = vadd.f32 1.0, %v547_v38  ;;  %v1180_v45 = vpop.eup %1179  ;;  %v537_v58 = vadd.f32 1.1283791, %v536_v49 }
 0x139   : > { %v510_v47 = vmul.f32 %v1180_v45, %v508_v36  ;;  %vm515_vm0 = vweird.f32 %v1180_v45 }
 0x13a   : > { %1181 = vrcp.f32 %v548_v41  ;;  %v560_v60 = vand.u32 2147483648, %v548_v41  ;;  %vm516_vm2 = vmor %vm514_vm1, %vm515_vm0  ;;  %v558_v33 = vand.u32 2147483647, %v548_v41  ;;  %vm554_vm5 = vweird.f32 %v548_v41 }
 0x13b   : > { %v511_v50 = vsub.f32 1.0, %v510_v47  ;;  %v538_v4 = vmul.f32 %v537_v58, %v1758_v44 }
 0x13c   : > { %v561_v3 = vor.u32 1.1754944e-38, %v560_v60  ;;  %vm559_vm7 = vcmp.eq.f32.partialorder %v558_v33, 8.507059e+37 }
 0x13d   : > { %v512_v55 = vmul.f32 %v1180_v45, %v511_v50 }
 0x13f   : > { %v513_v59 = vadd.f32 %v1180_v45, %v512_v55 }
 0x140   : > { %v1182_v48 = vpop.eup %1181 }
 0x141   : > { %v550_v52 = vmul.f32 %v1182_v48, %v548_v41  ;;  %vm555_vm3 = vweird.f32 %v1182_v48  ;;  %v517_v54 = vsel %vm516_vm2, %v1180_v45, %v513_v59 }
 0x142   : > { %v522_v0 = vsel %vm519_vm4, %v521_v61, %v517_v54  ;;  %vm556_vm6 = vmor %vm554_vm5, %vm555_vm3 }
 0x143   : > { %v551_v57 = vsub.f32 1.0, %v550_v52  ;;  %v523_v2 = vmul.f32 %v522_v0, %v498_v63 }
 0x145   : > { %v552_v62 = vmul.f32 %v1182_v48, %v551_v57  ;;  %v958_v6 = vclamps-f32 %v523_v2, 1.0 }
 0x147   : > { %v553_v1 = vadd.f32 %v1182_v48, %v552_v62  ;;  %v566_v10 = vadd.f32 1.0, %v958_v6 }
 0x149   : > { %v557_v5 = vsel %vm556_vm6, %v1182_v48, %v553_v1  ;;  %v568_v13 = vmul.f32 %v566_v10, %v482_v21 }
 0x14a   : > { %v562_v7 = vsel %vm559_vm7, %v561_v3, %v557_v5 }
 0x14b   : > { %v563_v8 = vmul.f32 %v562_v7, %v538_v4 }
 0x14d   : > { %v959_v9 = vclamps-f32 %v563_v8, 1.0 }
 0x14f   : > { %v567_v12 = vadd.f32 1.0, %v959_v9 }
 0x151   : > { %v569_v14 = vmul.f32 %v567_v12, %v483_v11 }
 0x153   : > { %v570_v15 = vpack.c.bf16 %v569_v14, %v568_v13 }
 0x155   : > { %675 = vmatmul.bf16.vlgmr.msra.gmra.mxu1 %v570_v15  ;;  %689 = vmatmul.bf16.vlgmr.msra.gmra.mxu2 %v570_v15 }
 0x1d2   : > { %v676_v16 = vpop.f32.mrf.mxu1 }
 0x1d8   : > { %v690_v44 = vpop.f32.mrf.mxu2 }
 0x1da   : > { %v678_v18 = vpop.f32.mrf.mxu1 }
 0x1dc   : > { %698 = sbr.rel (%p1024_p7) target bundleno = 490 (0x1ea), region = 60 }
 0x1e0   : > { %v692_v19 = vpop.f32.mrf.mxu2 }
 0x1e1   : > { %v699_v17 = vld [vmem:[%s1908_s4] sm:$0x3] }
 0x1e2   : > { %v701_v39 = vperm.slane %v699_v17, 0  ;;  %v702_v20 = vperm.slane %v699_v17, 1 }
 0x1e4   : > { %v705_v22 = vadd.f32 %v701_v39, %v676_v16  ;;  %v706_v23 = vadd.f32 %v702_v20, %v690_v44  ;;  %v707_v24 = vadd.f32 %v701_v39, %v678_v18  ;;  %v708_v25 = vadd.f32 %v702_v20, %v692_v19 }
 0x1e6   : > { %709 = vst [vmem:[%s1803_s17] sm:$0xff] %v705_v22 }
 0x1e7   : > { %710 = vst [vmem:[%s1803_s17 + $0x8] sm:$0xff] %v706_v23 }
 0x1e8   : > { %711 = vst [vmem:[%s1803_s17 + $0x10] sm:$0xff] %v707_v24 }
 0x1e9   : > { %712 = vst [vmem:[%s1803_s17 + $0x18] sm:$0xff] %v708_v25 }
 0x1ea PF: > { %p1025_p12 = scmp.eq.s32.totalorder %s1431_s24, 0 }
 0x1ec   : > { %716 = sbr.rel (%p1025_p12) target bundleno = 504 (0x1f8), region = 64 }
 0x1f1   : > { %v717_v26 = vld [vmem:[%s1803_s17] sm:$0xff]  ;;  %v718_v27 = vld [vmem:[%s1803_s17 + $0x8] sm:$0xff]  ;;  %v719_v28 = vld [vmem:[%s1803_s17 + $0x10] sm:$0xff] }
 0x1f2   : > { %v721_v29 = vadd.f32 %v717_v26, %v676_v16  ;;  %v722_v30 = vadd.f32 %v718_v27, %v690_v44  ;;  %v723_v31 = vadd.f32 %v719_v28, %v678_v18  ;;  %v720_v32 = vld [vmem:[%s1803_s17 + $0x18] sm:$0xff] }
 0x1f3   : > { %v724_v34 = vadd.f32 %v720_v32, %v692_v19 }
 0x1f4   : > { %725 = vst [vmem:[%s1803_s17] sm:$0xff] %v721_v29 }
 0x1f5   : > { %726 = vst [vmem:[%s1803_s17 + $0x8] sm:$0xff] %v722_v30 }
 0x1f6   : > { %727 = vst [vmem:[%s1803_s17 + $0x10] sm:$0xff] %v723_v31 }
 0x1f7   : > { %728 = vst [vmem:[%s1803_s17 + $0x18] sm:$0xff] %v724_v34 }
 0x1f8 PF: > { %s730_s24 = scalar_lea.sflag [#allocation4], %s1697_s1  ;;  %736 = sbr.rel (!%p1612_p4) target bundleno = 547 (0x223), region = 68 }
 0x1f9   : > { %s1945_s14 = sld [smem:[#allocation18_spill]] (%p1612_p4) }
 0x1ff   : > { %s1027_s6 = sshll.u32 %s1945_s14, 1 }
 0x200   : > { %s738_s27 = ssub.s32 3, %s1027_s6 }
 0x201   : > { %p739_p13 = scmp.lt.s32.totalorder %s738_s27, 2 }
 0x203   : > { %s1974_s27 = smov (!%p739_p13, %s738_s27), 2 }
 0x204   : > { %s1065_s21 = sshll.u32 %s1974_s27, 4 }
 0x205   : > { %s743_s11 = ssub.s32 32, %s1065_s21 }
 0x206   : > { %s744_s20 = sshll.u32 %s743_s11, 4 }
 0x207   : > { %745 = vsyncadd %s730_s24, %s744_s20  ;;  %p1831_p5 = scmp.ne.s32.totalorder %s1065_s21, 0  ;;  %s1067_s13 = sshll.u32 %s1945_s14, 5 }
 0x208   : > { %s1947_s23 = sld [smem:[#allocation27_spill]]  ;;  %s751_s18 = sshll.u32 %s1803_s17, 4  ;;  %s1840_s18 = int_to_ptr.vmem [resolvable:$true] %s751_s18 }
 0x209   : > { %s1034_s0 = sshll.u32 %s1974_s27, 8  ;;  %s1306_s8 = sshra.s32 %s1840_s18, 4  ;;  %s1307_s8 = int_to_ptr.vmem [resolvable:$true] %s1306_s8 }
 0x20a   : > { %s1308_s15 = sshrl.u32 %s1034_s0, 4  ;;  %s1457_s9 = smov [#allocation10]  }
 0x20b   : > { %s1313_s29 = scalar_lea.vmem %s1307_s8, %s1308_s15  ;;  %s1317_s25 = scalar_lea.vmem %s1457_s9, 64 }
 0x20c   : > { %p1314_p4 = scmp.ne.s32.totalorder %s1307_s8, %s1313_s29  ;;  %p1319_p1 = scmp.lt.s32.totalorder %s1317_s25, %s1313_s29 }
 0x20e   : > { %s1948_s30 = smov %s1947_s23  ;;  %s749_s5 = scalar_lea.hbm %s1947_s23, %s1067_s13 }
 0x20f   : > { %s753_s12 = sshll.u32 %s749_s5, 4  ;;  %p1315_p8 = pnand %p1314_p4, %p1831_p5  ;;  %s1842_s12 = int_to_ptr.hbm [resolvable:$true] %s753_s12 }
 0x211   : > { %p1316_p2 = pneg %p1315_p8 }
 0x213   : > { %p1321_p6 = pnand %p1319_p1, %p1316_p2 }
 0x215   : > { %1324 = shalt.err (!%p1321_p6)
}
 0x216   : > { %s1325_s17 = sshra.s32 %s1842_s12, 4  ;;  %s1336_s11 = scalar_lea.hbm %s1948_s30, 48  ;;  %s1326_s17 = int_to_ptr.hbm [resolvable:$true] %s1325_s17 }
 0x217   : > { %s1332_s14 = scalar_lea.hbm %s1326_s17, %s1308_s15  ;;  %p1337_p0 = scmp.lt.s32.totalorder %s1326_s17, %s1948_s30 }
 0x218   : > { %p1333_p9 = scmp.ne.s32.totalorder %s1326_s17, %s1332_s14  ;;  %p1338_p7 = scmp.lt.s32.totalorder %s1336_s11, %s1332_s14 }
 0x21a   : > { %p1334_p3 = pnand %p1333_p9, %p1831_p5  ;;  %p1339_p12 = por %p1338_p7, %p1337_p0 }
 0x21c   : > { %p1335_p11 = pneg %p1334_p3 }
 0x21e   : > { %p1340_p13 = pnand %p1339_p12, %p1335_p11 }
 0x220   : > { %1343 = shalt.err (!%p1340_p13)
}
 0x221   : > { %s1458_s7 = smov 256   ;;  %s1459_s16 = smov 16  }
 0x222   : > { %759 = dma.vmem_to_hbm [thread:$0]  (%p1831_p5), %s1840_s18, %s1034_s0, %s1842_s12, %s730_s24, %s1458_s7, %s1458_s7, %s1459_s16  }
 0x223 PF: > { %s1949_s23 = sld [smem:[#allocation16_spill]]  ;;  %p1080_p4 = scmp.ge.s32.totalorder %s1447_s28, 2 }
 0x225   : > { %p1077_p8 = pnand %p1080_p4, %p1619_p10 }
 0x227   : > { %p1078_p2 = pneg %p1077_p8 }
 0x229   : > { %s768_s8 = sand.u32 1, %s1949_s23  }
 0x22a   : > { %s769_s15 = scalar_lea.sflag [#allocation4], %s768_s8 }
 0x22b   : > { %1402 = dma.done.wait (%p1078_p2), %s769_s15, 512  }
 0x22c   : > { %1404 = vsyncadd (%p1078_p2), %s769_s15, 4294966784  ;;  %s27_s28 = sadd.s32 1, %s1447_s28   ;;  %s1951_s1 = sld [smem:[#allocation15_spill]] }
 0x22d   : > { %p24_p1 = scmp.ge.s32.totalorder %s27_s28, 10   ;;  %s1952_s20 = sld [smem:[#allocation22_spill]] }
 0x22e   : > { %s1953_s24 = sld [smem:[#allocation17_spill]]  ;;  %s1958_s18 = smov %s1411_s19 }
 0x22f   : > { %s1954_s23 = sld [smem:[#allocation23_spill]]  ;;  %s1960_s21 = smov %s1423_s22 }
 0x230   : > { %s1955_s25 = sld [smem:[#allocation19_spill]] }
 0x231   : > { %s1956_s27 = sld [smem:[#allocation20_spill]] }
 0x232   : > { %s1957_s10 = sld [smem:[#allocation21_spill]]  ;;  %s1959_s19 = smov %s1951_s1 }
 0x234   : > { %s1961_s22 = smov %s1953_s24  ;;  %s1962_s24 = smov %s1439_s26 }
 0x235   :  { %26 = sbr.rel (!%p24_p1) target bundleno = 17 (0x11), region = 130 }
 0x237   : > { %s1963_s26 = smov %s1956_s27 }
 0x238   : > { %s1964_s27 = smov %s1957_s10 }
 0x23a   :  { %775 = vsyncpa [#allocation3], 1 }
 0x23b   :  { %777 = vsyncpa [#allocation3 + $0x1], 1 }
 0x23c   :  { %778 = vsyncpa [#allocation6], 1 }
 0x23d   :  { %780 = vsyncpa [#allocation6 + $0x1], 1 }
 0x23e   :  { %781 = vsyncpa [#allocation9], 1 }
 0x23f   :  { %783 = vsyncpa [#allocation9 + $0x1], 1 }
 0x240   :  { %784 = vsyncpa [#allocation4], 1 }
 0x241   :  { %786 = vsyncpa [#allocation4 + $0x1], 1 }

</bundles_post_ra>
